<compile_context>
chip_gen: v5e
topology: v5e:2x2
jax: 0.10.0
libtpu: 0.0.40
codegen_flags: <defaults>
</compile_context>

<pallas_src>
import functools
import math

import jax
import jax.numpy as jnp
from jax import lax
from jax.experimental import pallas as pl
from jax.experimental.pallas import tpu as pltpu


def _round_up(x, m):
    return (x + m - 1) // m * m


def mha_kernel(xq_ref, xk_ref, xv_ref,
               wq_ref, bq_ref, wk_ref, bk_ref, wv_ref, bv_ref,
               wo_ref, bo_ref,
               o_ref, acc_ref, *, seq_len):
    """One (batch, query-tile, head) grid step, channel-major layout.

    xq_ref:          (1, C_pad, tq)     bf16   query activations (this q-tile)
    xk_ref/xv_ref:   (1, C_pad, S_pad)  bf16   key/value activations (full S)
    wq/wk/wv_ref:    (hd_pad, C_pad)    bf16   this head's projection rows
    bq/bk/bv_ref:    (hd_pad, 1)        f32    biases (scale folded into q)
    wo_ref:          (hd_pad, C_pad)    bf16   this head's out-proj rows (W_o^T)
    bo_ref:          (C_pad, 1)         f32
    o_ref:           (1, C_pad, tq)     bf16   output tile (written at last head)
    acc_ref:         (C_pad, tq)        f32    scratch accumulator over heads
    """
    h = pl.program_id(2)
    nh = pl.num_programs(2)

    @pl.when(h == 0)
    def _init():
        acc_ref[...] = jnp.zeros_like(acc_ref)

    xq = xq_ref[0]                       # (C_pad, tq)    bf16
    xk = xk_ref[0]                       # (C_pad, S_pad) bf16
    xv = xv_ref[0]

    # Per-head 1x1-conv projections (channel-major: W @ X), f32 accumulation,
    # then a single bf16 cast per tensor.
    qh = (jnp.dot(wq_ref[...], xq, preferred_element_type=jnp.float32)
          + bq_ref[...]).astype(jnp.bfloat16)          # (hd_pad, tq)
    kh = (jnp.dot(wk_ref[...], xk, preferred_element_type=jnp.float32)
          + bk_ref[...]).astype(jnp.bfloat16)          # (hd_pad, S_pad)
    vh = (jnp.dot(wv_ref[...], xv, preferred_element_type=jnp.float32)
          + bv_ref[...]).astype(jnp.bfloat16)          # (hd_pad, S_pad)

    # scores^T: (S_pad, tq) = K^T Q  (contract head_dim; scale already folded
    # into wq/bq).  Keys on the sublane axis -> the softmax denominator ends
    # up lane-oriented, matching the PV result below.
    s_t = lax.dot_general(kh, qh, (((0,), (0,)), ((), ())),
                          preferred_element_type=jnp.float32)

    s_pad = s_t.shape[0]
    if seq_len != s_pad:                 # static: mask zero-padded key rows
        kv_idx = lax.broadcasted_iota(jnp.int32, s_t.shape, 0)
        s_t = jnp.where(kv_idx < seq_len, s_t, -1e30)

    # Softmax over keys (axis 0).  exp kept in f32 (no bf16 EUP on v5e).
    m = jnp.max(s_t, axis=0, keepdims=True)            # (1, tq)
    p = jnp.exp(s_t - m)                                # (S_pad, tq) f32
    l = jnp.sum(p, axis=0, keepdims=True)               # (1, tq)

    # Unnormalized PV (contraction over S_pad keeps the MXU busy), then fold
    # 1/l into the small (hd_pad, tq) result via the EUP approx reciprocal.
    pv = jnp.dot(vh, p.astype(jnp.bfloat16),
                 preferred_element_type=jnp.float32)    # (hd_pad, tq)
    oh = (pv * pl.reciprocal(l, approx=True)).astype(jnp.bfloat16)

    # Block-row of the output projection for this head (no concat of heads).
    acc_ref[...] += lax.dot_general(wo_ref[...], oh, (((0,), (0,)), ((), ())),
                                    preferred_element_type=jnp.float32)

    @pl.when(h == nh - 1)
    def _finalize():
        o_ref[0] = (acc_ref[...] + bo_ref[...]).astype(o_ref.dtype)


def multi_head_attention(query, key, value, params, num_heads):
    """query/key/value: NCHW float32 arrays of shape (B, C, H, W)."""
    B, C, H, W = query.shape
    assert C % num_heads == 0, "in_channels must be divisible by num_heads"
    S = H * W
    hd = C // num_heads

    c_pad = _round_up(C, 8)          # sublane-aligned channels
    hd_pad = _round_up(hd, 8)        # sublane-aligned head_dim (NOT 128)
    s_pad = _round_up(S, 128)        # lane-dense sequence
    c_qkv_pad = num_heads * hd_pad

    # Query-tile size: largest of 512/256/128 that divides s_pad.
    tq = 128
    for cand in (512, 256):
        if s_pad % cand == 0:
            tq = cand
            break
    n_q = s_pad // tq

    # NCHW -> channel-major (B, C_pad, S_pad); reshape only (no transpose),
    # pad+cast fuse into a single pass.
    def to_cm(x):
        xs = x.reshape(B, C, S)
        xs = jnp.pad(xs, ((0, 0), (0, c_pad - C), (0, s_pad - S)))
        return xs.astype(jnp.bfloat16)

    xq, xk, xv = to_cm(query), to_cm(key), to_cm(value)

    # Conv2d(k=1) weight (C_out, C_in, 1, 1) is already W for W @ X.  Each
    # head's hd rows are padded to hd_pad with zero rows; zero bias rows keep
    # padded q/k/v channels exactly zero.
    def qkv_weight(wn, bn, scale=1.0):
        w = params[wn].reshape(C, C) * scale                 # (nh*hd, C_in)
        w = w.reshape(num_heads, hd, C)
        w = jnp.pad(w, ((0, 0), (0, hd_pad - hd), (0, c_pad - C)))
        w = w.reshape(c_qkv_pad, c_pad).astype(jnp.bfloat16)
        b = (params[bn] * scale).reshape(num_heads, hd)
        b = jnp.pad(b, ((0, 0), (0, hd_pad - hd)))
        b = b.reshape(c_qkv_pad, 1).astype(jnp.float32)
        return w, b

    # Out projection stored head-major-transposed: row (h*hd_pad + d) holds
    # W_o[:, h*hd + d], so the per-head block is a sublane-aligned row slice.
    def out_weight(wn, bn):
        w = jnp.transpose(params[wn].reshape(C, C))           # (nh*hd, C_out)
        w = w.reshape(num_heads, hd, C)
        w = jnp.pad(w, ((0, 0), (0, hd_pad - hd), (0, c_pad - C)))
        w = w.reshape(c_qkv_pad, c_pad).astype(jnp.bfloat16)
        b = jnp.pad(params[bn].reshape(C, 1), ((0, c_pad - C), (0, 0)))
        return w, b.astype(jnp.float32)

    scale = 1.0 / math.sqrt(hd)
    wq, bq = qkv_weight("wq", "bq", scale)   # softmax scale folded here
    wk, bk = qkv_weight("wk", "bk")
    wv, bv = qkv_weight("wv", "bv")
    wo, bo = out_weight("wo", "bo")

    xq_spec = pl.BlockSpec((1, c_pad, tq), lambda b, q, h: (b, 0, q))
    xkv_spec = pl.BlockSpec((1, c_pad, s_pad), lambda b, q, h: (b, 0, 0))
    w_spec = pl.BlockSpec((hd_pad, c_pad), lambda b, q, h: (h, 0))
    b_spec = pl.BlockSpec((hd_pad, 1), lambda b, q, h: (h, 0))
    bo_spec = pl.BlockSpec((c_pad, 1), lambda b, q, h: (0, 0))
    out_spec = pl.BlockSpec((1, c_pad, tq), lambda b, q, h: (b, 0, q))

    out_pad = pl.pallas_call(
        functools.partial(mha_kernel, seq_len=S),
        out_shape=jax.ShapeDtypeStruct((B, c_pad, s_pad), jnp.bfloat16),
        grid=(B, n_q, num_heads),
        in_specs=[xq_spec, xkv_spec, xkv_spec,
                  w_spec, b_spec,     # query_conv (scale folded)
                  w_spec, b_spec,     # key_conv
                  w_spec, b_spec,     # value_conv
                  w_spec, bo_spec],   # out_conv (transposed rows) + bias
        out_specs=out_spec,
        scratch_shapes=[pltpu.VMEM((c_pad, tq), jnp.float32)],
        compiler_params=pltpu.CompilerParams(
            dimension_semantics=("parallel", "parallel", "arbitrary")),
    )(xq, xk, xv, wq, bq, wk, bk, wv, bv, wo, bo)

    # Strip padding; channel-major is already NCHW order (no transpose).
    out = out_pad[:, :C, :S].astype(query.dtype).reshape(B, C, H, W)
    return out


def reference_mha(query, key, value, params, num_heads):
    """Pure-JAX f32 replica of the PyTorch forward (for verification)."""
    B, C, H, W = query.shape
    S = H * W
    hd = C // num_heads

    def conv1x1(x, w, b):
        return jnp.einsum('oc,bchw->bohw', w.reshape(C, C), x) + b[None, :, None, None]

    Q = conv1x1(query, params['wq'], params['bq']).reshape(B, num_heads, hd, S)
    K = conv1x1(key, params['wk'], params['bk']).reshape(B, num_heads, hd, S)
    V = conv1x1(value, params['wv'], params['bv']).reshape(B, num_heads, hd, S)
    Qp = jnp.transpose(Q, (0, 1, 3, 2))                 # (B, h, S, hd)
    scores = jnp.matmul(Qp, K) / math.sqrt(hd)          # (B, h, S, S)
    w = jax.nn.softmax(scores, axis=-1)
    ao = jnp.matmul(w, jnp.transpose(V, (0, 1, 3, 2)))  # (B, h, S, hd)
    ao = jnp.transpose(ao, (0, 1, 3, 2)).reshape(B, C, H, W)
    return conv1x1(ao, params['wo'], params['bo'])


def make_params(key, C):
    """Deterministic synthetic parameters (Conv2d 1x1 weights + biases)."""
    ks = jax.random.split(key, 8)
    scale = 1.0 / math.sqrt(C)
    params = {}
    names = [("wq", "bq"), ("wk", "bk"), ("wv", "bv"), ("wo", "bo")]
    for i, (wn, bn) in enumerate(names):
        params[wn] = jax.random.uniform(ks[2 * i], (C, C, 1, 1),
                                        minval=-scale, maxval=scale,
                                        dtype=jnp.float32)
        params[bn] = jax.random.uniform(ks[2 * i + 1], (C,),
                                        minval=-scale, maxval=scale,
                                        dtype=jnp.float32)
    return params


if __name__ == "__main__":
    B, C, H, W = 2, 16, 8, 8
    num_heads = 4

    root = jax.random.PRNGKey(0)
    kq, kk, kv, kp = jax.random.split(root, 4)
    query = jax.random.normal(kq, (B, C, H, W), dtype=jnp.float32)
    key = jax.random.normal(kk, (B, C, H, W), dtype=jnp.float32)
    value = jax.random.normal(kv, (B, C, H, W), dtype=jnp.float32)
    params = make_params(kp, C)

    out = multi_head_attention(query, key, value, params, num_heads)
    out = jax.block_until_ready(out)

    ref = reference_mha(query, key, value, params, num_heads)
    assert out.shape == (B, C, H, W)
    # bf16 MXU operands / bf16 output (f32 accumulation) -> loosened tolerance.
    assert jnp.allclose(out, ref, atol=5e-2, rtol=5e-2), "mismatch vs reference"

    print("KERNEL_OK")
</pallas_src>

<mosaic_0001>
module attributes {stable_mosaic.version = 11 : i64} {
  func.func @mha_kernel(%arg0: i32, %arg1: i32, %arg2: i32, %arg3: memref<1x16x128xbf16, #tpu.memory_space<vmem>>, %arg4: memref<1x16x128xbf16, #tpu.memory_space<vmem>>, %arg5: memref<1x16x128xbf16, #tpu.memory_space<vmem>>, %arg6: memref<8x16xbf16, #tpu.memory_space<vmem>>, %arg7: memref<8x1xf32, #tpu.memory_space<vmem>>, %arg8: memref<8x16xbf16, #tpu.memory_space<vmem>>, %arg9: memref<8x1xf32, #tpu.memory_space<vmem>>, %arg10: memref<8x16xbf16, #tpu.memory_space<vmem>>, %arg11: memref<8x1xf32, #tpu.memory_space<vmem>>, %arg12: memref<8x16xbf16, #tpu.memory_space<vmem>>, %arg13: memref<16x1xf32, #tpu.memory_space<vmem>>, %arg14: memref<1x16x128xbf16, #tpu.memory_space<vmem>>, %arg15: memref<16x128xf32, #tpu.memory_space<vmem>>) attributes {dimension_semantics = [#tpu.dimension_semantics<parallel>, #tpu.dimension_semantics<parallel>, #tpu.dimension_semantics<arbitrary>], iteration_bounds = array<i64: 2, 1, 4>, scalar_prefetch = 0 : i64, scratch_operands = 1 : i64, tpu.core_type = #tpu.core_type<tc>, window_params = [{transform_indices = @transform_0, window_bounds = array<i64: 1, 16, 128>}, {transform_indices = @transform_1, window_bounds = array<i64: 1, 16, 128>}, {transform_indices = @transform_2, window_bounds = array<i64: 1, 16, 128>}, {transform_indices = @transform_3, window_bounds = array<i64: 8, 16>}, {transform_indices = @transform_4, window_bounds = array<i64: 8, 1>}, {transform_indices = @transform_5, window_bounds = array<i64: 8, 16>}, {transform_indices = @transform_6, window_bounds = array<i64: 8, 1>}, {transform_indices = @transform_7, window_bounds = array<i64: 8, 16>}, {transform_indices = @transform_8, window_bounds = array<i64: 8, 1>}, {transform_indices = @transform_9, window_bounds = array<i64: 8, 16>}, {pipeline_mode = #tpu.pipeline_mode<synchronous>, transform_indices = @transform_10, window_bounds = array<i64: 16, 1>}, {transform_indices = @transform_11, window_bounds = array<i64: 1, 16, 128>}]} {
    %c0_i32 = arith.constant 0 : i32
    %0 = arith.cmpi eq, %arg2, %c0_i32 : i32
    %1 = arith.extui %0 : i1 to i32
    %c0_i32_0 = arith.constant 0 : i32
    %2 = arith.cmpi ne, %1, %c0_i32_0 : i32
    scf.if %2 {
      %cst_36 = arith.constant 0.000000e+00 : f32
      %54 = vector.broadcast %cst_36 : f32 to vector<16x128xf32>
      %c0_37 = arith.constant 0 : index
      %c0_38 = arith.constant 0 : index
      %55 = vector.load %arg15[%c0_37, %c0_38] : memref<16x128xf32, #tpu.memory_space<vmem>>, vector<16x128xf32>
      tpu.vector_store %arg15[%c0_37, %c0_38], %54 {strides = array<i32>} : memref<16x128xf32, #tpu.memory_space<vmem>>, vector<16x128xf32>,
    } else {
    }
    %c0 = arith.constant 0 : index
    %c0_1 = arith.constant 0 : index
    %c0_2 = arith.constant 0 : index
    %3 = vector.load %arg3[%c0, %c0_1, %c0_2] : memref<1x16x128xbf16, #tpu.memory_space<vmem>>, vector<1x16x128xbf16>
    %4 = vector.shape_cast %3 : vector<1x16x128xbf16> to vector<16x128xbf16>
    %c0_3 = arith.constant 0 : index
    %c0_4 = arith.constant 0 : index
    %c0_5 = arith.constant 0 : index
    %5 = vector.load %arg4[%c0_3, %c0_4, %c0_5] : memref<1x16x128xbf16, #tpu.memory_space<vmem>>, vector<1x16x128xbf16>
    %6 = vector.shape_cast %5 : vector<1x16x128xbf16> to vector<16x128xbf16>
    %c0_6 = arith.constant 0 : index
    %c0_7 = arith.constant 0 : index
    %c0_8 = arith.constant 0 : index
    %7 = vector.load %arg5[%c0_6, %c0_7, %c0_8] : memref<1x16x128xbf16, #tpu.memory_space<vmem>>, vector<1x16x128xbf16>
    %8 = vector.shape_cast %7 : vector<1x16x128xbf16> to vector<16x128xbf16>
    %c0_9 = arith.constant 0 : index
    %c0_10 = arith.constant 0 : index
    %9 = vector.load %arg6[%c0_9, %c0_10] : memref<8x16xbf16, #tpu.memory_space<vmem>>, vector<8x16xbf16>
    %cst = arith.constant dense<0.000000e+00> : vector<8x128xf32>
    %10 = tpu.matmul %9, %4, %cst {dimension_numbers = #tpu.dot_dimension_numbers<[1], [0], [0], [1], [0, 0, 1, 1], [], []>} : vector<8x16xbf16>, vector<16x128xbf16>, vector<8x128xf32> -> vector<8x128xf32>
    %c0_11 = arith.constant 0 : index
    %c0_12 = arith.constant 0 : index
    %11 = vector.load %arg7[%c0_11, %c0_12] : memref<8x1xf32, #tpu.memory_space<vmem>>, vector<8x1xf32>
    %12 = vector.broadcast %11 : vector<8x1xf32> to vector<8x128xf32>
    %13 = arith.addf %10, %12 : vector<8x128xf32>
    %14 = arith.truncf %13 : vector<8x128xf32> to vector<8x128xbf16>
    %c0_13 = arith.constant 0 : index
    %c0_14 = arith.constant 0 : index
    %15 = vector.load %arg8[%c0_13, %c0_14] : memref<8x16xbf16, #tpu.memory_space<vmem>>, vector<8x16xbf16>
    %cst_15 = arith.constant dense<0.000000e+00> : vector<8x128xf32>
    %16 = tpu.matmul %15, %6, %cst_15 {dimension_numbers = #tpu.dot_dimension_numbers<[1], [0], [0], [1], [0, 0, 1, 1], [], []>} : vector<8x16xbf16>, vector<16x128xbf16>, vector<8x128xf32> -> vector<8x128xf32>
    %c0_16 = arith.constant 0 : index
    %c0_17 = arith.constant 0 : index
    %17 = vector.load %arg9[%c0_16, %c0_17] : memref<8x1xf32, #tpu.memory_space<vmem>>, vector<8x1xf32>
    %18 = vector.broadcast %17 : vector<8x1xf32> to vector<8x128xf32>
    %19 = arith.addf %16, %18 : vector<8x128xf32>
    %20 = arith.truncf %19 : vector<8x128xf32> to vector<8x128xbf16>
    %c0_18 = arith.constant 0 : index
    %c0_19 = arith.constant 0 : index
    %21 = vector.load %arg10[%c0_18, %c0_19] : memref<8x16xbf16, #tpu.memory_space<vmem>>, vector<8x16xbf16>
    %cst_20 = arith.constant dense<0.000000e+00> : vector<8x128xf32>
    %22 = tpu.matmul %21, %8, %cst_20 {dimension_numbers = #tpu.dot_dimension_numbers<[1], [0], [0], [1], [0, 0, 1, 1], [], []>} : vector<8x16xbf16>, vector<16x128xbf16>, vector<8x128xf32> -> vector<8x128xf32>
    %c0_21 = arith.constant 0 : index
    %c0_22 = arith.constant 0 : index
    %23 = vector.load %arg11[%c0_21, %c0_22] : memref<8x1xf32, #tpu.memory_space<vmem>>, vector<8x1xf32>
    %24 = vector.broadcast %23 : vector<8x1xf32> to vector<8x128xf32>
    %25 = arith.addf %22, %24 : vector<8x128xf32>
    %26 = arith.truncf %25 : vector<8x128xf32> to vector<8x128xbf16>
    %cst_23 = arith.constant dense<0.000000e+00> : vector<128x128xf32>
    %27 = tpu.matmul %20, %14, %cst_23 {dimension_numbers = #tpu.dot_dimension_numbers<[0], [0], [1], [1], [0, 1, 1, 1], [], []>} : vector<8x128xbf16>, vector<8x128xbf16>, vector<128x128xf32> -> vector<128x128xf32>
    %28 = tpu.iota {dimensions = array<i32: 0>} : vector<128x128xi32>
    %c64_i32 = arith.constant 64 : i32
    %29 = vector.broadcast %c64_i32 : i32 to vector<128x128xi32>
    %30 = arith.cmpi slt, %28, %29 : vector<128x128xi32>
    %cst_24 = arith.constant -1.000000e+30 : f32
    %31 = vector.broadcast %cst_24 : f32 to vector<128x128xf32>
    %32 = arith.select %30, %27, %31 : vector<128x128xi1>, vector<128x128xf32>
    %cst_25 = arith.constant dense<0xFF800000> : vector<128xf32>
    %33 = vector.multi_reduction <maximumf>, %32, %cst_25 [0] : vector<128x128xf32> to vector<128xf32>
    %34 = vector.shape_cast %33 : vector<128xf32> to vector<1x128xf32>
    %35 = vector.broadcast %34 : vector<1x128xf32> to vector<128x128xf32>
    %36 = arith.subf %32, %35 : vector<128x128xf32>
    %37 = math.exp %36 : vector<128x128xf32>
    %cst_26 = arith.constant dense<0.000000e+00> : vector<128xf32>
    %38 = vector.multi_reduction <add>, %37, %cst_26 [0] : vector<128x128xf32> to vector<128xf32>
    %39 = vector.shape_cast %38 : vector<128xf32> to vector<1x128xf32>
    %40 = arith.truncf %37 : vector<128x128xf32> to vector<128x128xbf16>
    %cst_27 = arith.constant dense<0.000000e+00> : vector<8x128xf32>
    %41 = tpu.matmul %26, %40, %cst_27 {dimension_numbers = #tpu.dot_dimension_numbers<[1], [0], [0], [1], [0, 0, 1, 1], [], []>} : vector<8x128xbf16>, vector<128x128xbf16>, vector<8x128xf32> -> vector<8x128xf32>
    %42 = tpu.reciprocal %39 {approx = true} : vector<1x128xf32> -> vector<1x128xf32>
    %43 = vector.broadcast %42 : vector<1x128xf32> to vector<8x128xf32>
    %44 = arith.mulf %41, %43 : vector<8x128xf32>
    %45 = arith.truncf %44 : vector<8x128xf32> to vector<8x128xbf16>
    %c0_28 = arith.constant 0 : index
    %c0_29 = arith.constant 0 : index
    %46 = vector.load %arg15[%c0_28, %c0_29] : memref<16x128xf32, #tpu.memory_space<vmem>>, vector<16x128xf32>
    %c0_30 = arith.constant 0 : index
    %c0_31 = arith.constant 0 : index
    %47 = vector.load %arg12[%c0_30, %c0_31] : memref<8x16xbf16, #tpu.memory_space<vmem>>, vector<8x16xbf16>
    %cst_32 = arith.constant dense<0.000000e+00> : vector<16x128xf32>
    %48 = tpu.matmul %47, %45, %cst_32 {dimension_numbers = #tpu.dot_dimension_numbers<[0], [0], [1], [1], [0, 1, 1, 1], [], []>} : vector<8x16xbf16>, vector<8x128xbf16>, vector<16x128xf32> -> vector<16x128xf32>
    %49 = arith.addf %46, %48 : vector<16x128xf32>
    %c0_33 = arith.constant 0 : index
    %c0_34 = arith.constant 0 : index
    %50 = vector.load %arg15[%c0_33, %c0_34] : memref<16x128xf32, #tpu.memory_space<vmem>>, vector<16x128xf32>
    tpu.vector_store %arg15[%c0_33, %c0_34], %49 {strides = array<i32>} : memref<16x128xf32, #tpu.memory_space<vmem>>, vector<16x128xf32>,
    %c3_i32 = arith.constant 3 : i32
    %51 = arith.cmpi eq, %arg2, %c3_i32 : i32
    %52 = arith.extui %51 : i1 to i32
    %c0_i32_35 = arith.constant 0 : i32
    %53 = arith.cmpi ne, %52, %c0_i32_35 : i32
    scf.if %53 {
      %c0_36 = arith.constant 0 : index
      %c0_37 = arith.constant 0 : index
      %54 = vector.load %arg15[%c0_36, %c0_37] : memref<16x128xf32, #tpu.memory_space<vmem>>, vector<16x128xf32>
      %c0_38 = arith.constant 0 : index
      %c0_39 = arith.constant 0 : index
      %55 = vector.load %arg13[%c0_38, %c0_39] : memref<16x1xf32, #tpu.memory_space<vmem>>, vector<16x1xf32>
      %56 = vector.broadcast %55 : vector<16x1xf32> to vector<16x128xf32>
      %57 = arith.addf %54, %56 : vector<16x128xf32>
      %58 = arith.truncf %57 : vector<16x128xf32> to vector<16x128xbf16>
      %c0_40 = arith.constant 0 : index
      %c0_41 = arith.constant 0 : index
      %c0_42 = arith.constant 0 : index
      %59 = vector.load %arg14[%c0_40, %c0_41, %c0_42] : memref<1x16x128xbf16, #tpu.memory_space<vmem>>, vector<1x16x128xbf16>
      %60 = vector.shape_cast %59 : vector<1x16x128xbf16> to vector<16x128xbf16>
      %61 = vector.shape_cast %58 : vector<16x128xbf16> to vector<1x16x128xbf16>
      tpu.vector_store %arg14[%c0_40, %c0_41, %c0_42], %61 {strides = array<i32>} : memref<1x16x128xbf16, #tpu.memory_space<vmem>>, vector<1x16x128xbf16>,
    } else {
    }
    return
  }
  func.func @transform_0(%arg0: i32, %arg1: i32, %arg2: i32) -> (i32, i32, i32) {
    %c0_i32 = arith.constant 0 : i32
    %c0_i32_0 = arith.constant 0 : i32
    return %arg0, %c0_i32, %arg1 : i32, i32, i32
  }
  func.func @transform_1(%arg0: i32, %arg1: i32, %arg2: i32) -> (i32, i32, i32) {
    %c0_i32 = arith.constant 0 : i32
    %c0_i32_0 = arith.constant 0 : i32
    %c0_i32_1 = arith.constant 0 : i32
    return %arg0, %c0_i32, %c0_i32_0 : i32, i32, i32
  }
  func.func @transform_2(%arg0: i32, %arg1: i32, %arg2: i32) -> (i32, i32, i32) {
    %c0_i32 = arith.constant 0 : i32
    %c0_i32_0 = arith.constant 0 : i32
    %c0_i32_1 = arith.constant 0 : i32
    return %arg0, %c0_i32, %c0_i32_0 : i32, i32, i32
  }
  func.func @transform_3(%arg0: i32, %arg1: i32, %arg2: i32) -> (i32, i32) {
    %c0_i32 = arith.constant 0 : i32
    %c0_i32_0 = arith.constant 0 : i32
    return %arg2, %c0_i32 : i32, i32
  }
  func.func @transform_4(%arg0: i32, %arg1: i32, %arg2: i32) -> (i32, i32) {
    %c0_i32 = arith.constant 0 : i32
    %c0_i32_0 = arith.constant 0 : i32
    return %arg2, %c0_i32 : i32, i32
  }
  func.func @transform_5(%arg0: i32, %arg1: i32, %arg2: i32) -> (i32, i32) {
    %c0_i32 = arith.constant 0 : i32
    %c0_i32_0 = arith.constant 0 : i32
    return %arg2, %c0_i32 : i32, i32
  }
  func.func @transform_6(%arg0: i32, %arg1: i32, %arg2: i32) -> (i32, i32) {
    %c0_i32 = arith.constant 0 : i32
    %c0_i32_0 = arith.constant 0 : i32
    return %arg2, %c0_i32 : i32, i32
  }
  func.func @transform_7(%arg0: i32, %arg1: i32, %arg2: i32) -> (i32, i32) {
    %c0_i32 = arith.constant 0 : i32
    %c0_i32_0 = arith.constant 0 : i32
    return %arg2, %c0_i32 : i32, i32
  }
  func.func @transform_8(%arg0: i32, %arg1: i32, %arg2: i32) -> (i32, i32) {
    %c0_i32 = arith.constant 0 : i32
    %c0_i32_0 = arith.constant 0 : i32
    return %arg2, %c0_i32 : i32, i32
  }
  func.func @transform_9(%arg0: i32, %arg1: i32, %arg2: i32) -> (i32, i32) {
    %c0_i32 = arith.constant 0 : i32
    %c0_i32_0 = arith.constant 0 : i32
    return %arg2, %c0_i32 : i32, i32
  }
  func.func @transform_10(%arg0: i32, %arg1: i32, %arg2: i32) -> (i32, i32) {
    %c0_i32 = arith.constant 0 : i32
    %c0_i32_0 = arith.constant 0 : i32
    %c0_i32_1 = arith.constant 0 : i32
    return %c0_i32, %c0_i32_0 : i32, i32
  }
  func.func @transform_11(%arg0: i32, %arg1: i32, %arg2: i32) -> (i32, i32, i32) {
    %c0_i32 = arith.constant 0 : i32
    %c0_i32_0 = arith.constant 0 : i32
    return %arg0, %c0_i32, %arg1 : i32, i32, i32
  }
}

</mosaic_0001>

<bundles_post_ra>
// kernel: tpu_custom_call.1
= control target key start
LH: loop header
LB: loop body
LE: loop exit
PB: predicated region body
PF: predicated region fallthrough
CT: control target
= control target key end

     0   :  { %s1751_s0 = inlined_call_operand.vmem [shape: bf16[2,16,128], index: 0, kind: input, shape index: {}]   ;;  %s1752_s1 = inlined_call_operand.vmem [shape: bf16[2,16,128], index: 1, kind: input, shape index: {}]   ;;  %s1753_s2 = inlined_call_operand.vmem [shape: bf16[2,16,128], index: 2, kind: input, shape index: {}]   ;;  %s1754_s3 = inlined_call_operand.vmem [shape: bf16[32,16], index: 3, kind: input, shape index: {}]   ;;  %s1755_s4 = inlined_call_operand.vmem [shape: f32[32,1], index: 4, kind: input, shape index: {}]   ;;  %s1756_s5 = inlined_call_operand.vmem [shape: bf16[32,16], index: 5, kind: input, shape index: {}]   ;;  %s1757_s6 = inlined_call_operand.vmem [shape: f32[32,1], index: 6, kind: input, shape index: {}]   ;;  %s1758_s7 = inlined_call_operand.vmem [shape: bf16[32,16], index: 7, kind: input, shape index: {}]   ;;  %s1759_s8 = inlined_call_operand.vmem [shape: f32[32,1], index: 8, kind: input, shape index: {}]   ;;  %s1760_s9 = inlined_call_operand.vmem [shape: bf16[32,16], index: 9, kind: input, shape index: {}]   ;;  %s1761_s10 = inlined_call_operand.vmem [shape: f32[16,1], index: 10, kind: input, shape index: {}]   ;;  %s1762_s11 = inlined_call_operand.hbm [shape: bf16[2,16,128], index: 11, kind: output, shape index: {}]  }
   0x1   :  { %1778 = sst [smem:[#allocation18_spill]] %s1751_s0 }
   0x2   :  { %1779 = sst [smem:[#allocation19_spill]] %s1752_s1 }
   0x3   :  { %1780 = sst [smem:[#allocation20_spill]] %s1754_s3 }
   0x4   :  { %1781 = sst [smem:[#allocation21_spill]] %s1755_s4 }
   0x5   :  { %1782 = sst [smem:[#allocation22_spill]] %s1761_s10 }
   0x6   :  { %1783 = sst [smem:[#allocation23_spill]] %s1762_s11 }
   0x7   :  { %16 = vsyncpa [#allocation4], 0 }
   0x8   :  { %18 = vsyncpa [#allocation4 + $0x1], 0  ;;  %s1536_s17 = smov 0   ;;  %s1538_s18 = smov 0  }
   0x9   :  { %s1540_s19 = smov 0   ;;  %s1542_s20 = smov 0  }
   0xa   :  { %s1544_s21 = smov 0   ;;  %s1546_s22 = smov 0  }
   0xb   :  { %s1548_s23 = smov 0   ;;  %s1550_s24 = smov 0  }
   0xc LB: > { %1784 = sst [smem:[#allocation6_spill]] %s1441_s17  ;;  %s1213_s25 = sadd.s32 4294967295, %s1469_s24   ;;  %s1469_s24 = sphi %s1550_s24, %s24_s24   ;;  %s1465_s23 = sphi %s1548_s23, %s1818_s23   ;;  %s1461_s22 = sphi %s1546_s22, %s1817_s22   ;;  %s1457_s21 = sphi %s1544_s21, %s1816_s21   ;;  %s1453_s20 = sphi %s1542_s20, %s1815_s20   ;;  %s1449_s19 = sphi %s1540_s19, %s1814_s19   ;;  %s1445_s18 = sphi %s1538_s18, %s1813_s18   ;;  %s1441_s17 = sphi %s1536_s17, %s1812_s17  }
   0xd   : > { %1785 = sst [smem:[#allocation7_spill]] %s1445_s18  ;;  %s1214_s26 = sadd.s32 4294967294, %s1469_s24  }
   0xe   : > { %1786 = sst [smem:[#allocation8_spill]] %s1449_s19  ;;  %s36_s27 = sadd.s32 1, %s1461_s22 }
   0xf   : > { %1787 = sst [smem:[#allocation9_spill]] %s1457_s21  ;;  %p37_p0 = scmp.ge.s32.totalorder %s36_s27, 4 }
  0x10   : > { %1788 = sst [smem:[#allocation10_spill]] %s1461_s22  ;;  %s43_s28 = sadd.s32 1, %s1465_s23 }
  0x11   : > { %1789 = sst [smem:[#allocation11_spill]] %s1465_s23  ;;  %p345_p1 = scmp.ne.s32.totalorder %s1449_s19, %s1445_s18 }
  0x12   : > { %1790 = sst [smem:[#allocation12_spill]] %s1469_s24  ;;  %p346_p2 = scmp.eq.s32.totalorder %s1213_s25, 7 }
  0x13   : > { %s1820_s27 = smov (%p37_p0, %s36_s27), 0  ;;  %s1822_s28 = smov (!%p37_p0, %s43_s28), %s1465_s23 }
  0x14   : > { %1791 = sst [smem:[#allocation13_spill]] %s1820_s27  ;;  %p1585_p3 = por %p346_p2, %p345_p1 }
  0x15   : > { %p351_p4 = scmp.ne.s32.totalorder %s1445_s18, %s1441_s17  ;;  %p45_p5 = scmp.ge.s32.totalorder %s1822_s28, 2 }
  0x16   : > { %s1792_s29 = scalar_select %p1585_p3, 1, 0 }
  0x17   : > { %p352_p6 = scmp.eq.s32.totalorder %s1214_s26, 7  ;;  %p1217_p7 = scmp.ge.s32.totalorder %s1469_s24, 1 }
  0x18   : > { %1793 = sst [smem:[#allocation14_spill]] %s1792_s29  ;;  %p449_p8 = scmp.lt.s32.totalorder %s1469_s24, 9 }
  0x19   : > { %s1824_s28 = smov (%p45_p5, %s1822_s28), 0  ;;  %p1595_p9 = por %p352_p6, %p351_p4 }
  0x1a   : > { %1794 = sst [smem:[#allocation15_spill]] %s1824_s28  ;;  %p450_p10 = pnand %p1217_p7, %p449_p8 }
  0x1b   : > { %s1795_s30 = scalar_select %p1595_p9, 1, 0 }
  0x1c   : > { %s330_s12 = ssub.s32 %s1465_s23, %s1824_s28  ;;  %s335_s13 = sadd.s32 1, %s1449_s19 }
  0x1d   : > { %1796 = sst [smem:[#allocation16_spill]] %s1795_s30  ;;  %p333_p11 = scmp.eq.s32.totalorder %s330_s12, 0 }
  0x1e   : > { %453 = sbr.rel (%p450_p10) target bundleno = 1043 (0x413), region = 64  ;;  %s1767_s15 = sand.u32 (!%p450_p10), 1, %s1445_s18  }
  0x1f   : > { %s1603_s14 = scalar_select %p333_p11, %s1449_s19, %s335_s13  }
  0x20   : > { %p530_p12 = scmp.lt.s32.totalorder (!%p450_p10), %s1457_s21, 1  ;;  %s1609_s16 = sshll.u32 (!%p450_p10), %s1767_s15, 3 }
  0x21   : > { %1797 = sst [smem:[#allocation17_spill]] %s1603_s14  ;;  %p548_p13 = scmp.lt.s32.totalorder (!%p450_p10), %s1453_s20, 3 }
  0x22   : > { %s1798_s0 = sld [smem:[#allocation18_spill]] (!%p450_p10)  ;;  %s529_s10 = scalar_lea.vmem (!%p450_p10), [#allocation3], %s1609_s16 }
  0x23   : > { %s531_s25 = scalar_select %p530_p12, %s1457_s21, 1 }
  0x24   : > { %s549_s26 = scalar_select %p548_p13, %s1453_s20, 3 }
  0x25   : > { %s1614_s28 = sshll.u32 %s531_s25, 3  ;;  %s1799_s1 = sld [smem:[#allocation19_spill]] }
  0x26   : > { %s1628_s17 = sshll.u32 %s549_s26, 2  ;;  %s1800_s3 = sld [smem:[#allocation20_spill]] }
  0x27   : > { %s1634_s13 = sshll.u32 %s549_s26, 3  ;;  %s1801_s4 = sld [smem:[#allocation21_spill]] }
  0x28   : > { %s537_s27 = scalar_lea.vmem %s1798_s0, %s1614_s28  ;;  %s559_s30 = scalar_lea.vmem %s1756_s5, %s1628_s17 }
  0x29   : > { %s563_s24 = scalar_lea.vmem %s1757_s6, %s1634_s13  ;;  %s567_s26 = scalar_lea.vmem %s1758_s7, %s1628_s17 }
  0x2a   : > { %s571_s21 = scalar_lea.vmem %s1759_s8, %s1634_s13  ;;  %p1232_p0 = scmp.ne.s32.totalorder %s1453_s20, 0 }
  0x2b   : > { %s542_s14 = scalar_lea.vmem %s1799_s1, %s1614_s28 }
  0x2c   : > { %s551_s12 = scalar_lea.vmem %s1800_s3, %s1628_s17  ;;  %580 = sbr.rel (%p1232_p0) target bundleno = 52 (0x34), region = 68 }
  0x2d   : > { %s555_s19 = scalar_lea.vmem %s1801_s4, %s1634_s13  ;;  %s575_s4 = scalar_lea.vmem %s1760_s9, %s1628_s17 }
  0x31   : > { %v1471_v0 = vmov 0.0  }
  0x32   : > { %581 = vst [vmem:[#allocation2] sm:$0xff] %v1471_v0 }
  0x33   : > { %582 = vst [vmem:[#allocation2 + $0x8] sm:$0xff] %v1471_v0 }
  0x34 PF: > { %v1266_v1 = vld [vmem:[%s537_s27] sm:$0xff]  ;;  %v1472_v3 = vmov 0   ;;  %vm602_vm0 = vcmask 130048   ;;  %vm721_vm1 = vcmask 1043456   ;;  %vm696_vm2 = vcmask 64512   ;;  %s1802_s11 = scalar_lea.vmem %s1753_s2, %s1614_s28  ;;  %p1257_p1 = scmp.ne.s32.totalorder %s1453_s20, 3 }
  0x35   : > { %v1267_v2 = vld [vmem:[%s542_s14] sm:$0xff]  ;;  %1352 = vset.pattern.permute.xlu0 %v1472_v3  ;;  %613 = vmatpush.bf16.msra.mxu0 %v1266_v1  ;;  %s1803_s14 = sld [smem:[#allocation22_spill]] (!%p1257_p1) }
  0x36   : > { %v621_v4 = vld [vmem:[%s563_s24] sm:$0xff]  ;;  %643 = vmatpush.bf16.msra.mxu1 %v1267_v2 }
  0x37   : > { %v589_v5 = vld [vmem:[%s551_s12] sm:$0xf]  ;;  %624 = vperm.xlu0 %1352, %v621_v4  }
  0x38   : > { %v620_v6 = vld [vmem:[%s559_s30] sm:$0xf]  ;;  %1237 = vmatmul.msk.bf16.vlgmr.msra.gmra.mxu0 %vm602_vm0, %v589_v5 }
  0x39   : > { %1242 = vmatmul.msk.bf16.vlgmr.msra.gmra.mxu1 %vm602_vm0, %v620_v6  ;;  %v590_v7 = vld [vmem:[%s555_s19] sm:$0xff] }
  0x3a   : > { %v1268_v21 = vld [vmem:[%s1802_s11] sm:$0xff] }
  0x3b   : > { %673 = vmatpush.bf16.msrb.mxu1 %v1268_v21  ;;  %v650_v22 = vld [vmem:[%s567_s26] sm:$0xf] }
  0x3c   : > { %v651_v25 = vld [vmem:[%s571_s21] sm:$0xff] }
  0x3d   : > { %v939_v54 = vld [vmem:[%s575_s4] sm:$0xf] }
  0x3e   : > { %940 = vxpose.xlu2.c.b16.start.end [1/1] (short) (narrow) %v939_v54, 16 }
  0x3f   : > { %593 = vperm.xlu0 %1352, %v590_v7  }
  0x49   : > { %1247 = vmatmul.msk.bf16.vlgmr.msrb.gmra.mxu1 %vm602_vm0, %v650_v22 }
  0xa9   : > { %v625_v8 = vpop.permute.xlu0 %624 }
  0xb1   : > { %v594_v9 = vpop.permute.xlu0 %593 }
  0xb5   : > { %v615_v10 = vpop.f32.mrf.mxu0 }
  0xb6   : > { %v645_v11 = vpop.f32.mrf.mxu1  ;;  %v616_v12 = vadd.f32 %v615_v10, %v594_v9 }
  0xb7   : > { %v646_v13 = vadd.f32 %v645_v11, %v625_v8 }
  0xb8   : > { %v619_v14 = vpack.c.bf16 %v616_v12, %v616_v12 }
  0xb9   : > { %v649_v15 = vpack.c.bf16 %v646_v13, %v646_v13 }
  0xba   : > { %v723_v16 = vsel %vm721_vm1, %v619_v14, 0 }
  0xbb   : > { %680 = vxpose.xlu1.c.b16.start.end [1/1] (short) %v649_v15, 128  ;;  %732 = vmatpush.bf16.msra.mxu2 %v723_v16 }
  0xbc   : > { %1275 = vmatpush.bf16.msra.mxu3 %v723_v16 }
  0xbd   : > { %v617_v18 = vpop.f32.mrf.mxu0 }
  0xbe   : > { %v647_v17 = vpop.f32.mrf.mxu1 }
  0xc6   : > { %v675_v7 = vpop.f32.mrf.mxu1 }
 0x10e   : > { %1353 = vset.pattern.permute.xlu1 %v1472_v3 }
 0x167   : > { %v688_v19 = vpop.trf.xlu1 }
 0x168   : > { %1248 = vmatmul.msk.bf16.vlgmr.msra.gmra.mxu2 %vm696_vm2, %v688_v19 }
 0x177   : > { %v689_v20 = vpop.trf.xlu1 }
 0x178   : > { %1249 = vmatmul.msk.bf16.gmra.mxu2 %vm696_vm2, %v689_v20  ;;  %v677_v20 = vpop.f32.mrf.mxu1 }
 0x185   : > { %654 = vperm.xlu1 %1353, %v651_v25  }
 0x187   : > { %v690_v23 = vpop.trf.xlu1 }
 0x188   : > { %1250 = vmatmul.msk.bf16.gmra.mxu2 %vm696_vm2, %v690_v23 }
 0x197   : > { %v691_v24 = vpop.trf.xlu1 }
 0x198   : > { %1251 = vmatmul.msk.bf16.gmra.mxu2 %vm696_vm2, %v691_v24 }
 0x1a7   : > { %v692_v29 = vpop.trf.xlu1 }
 0x1a8   : > { %1252 = vmatmul.msk.bf16.vlgmr.msra.gmra.mxu3 %vm696_vm2, %v692_v29 }
 0x1b7   : > { %v693_v33 = vpop.trf.xlu1 }
 0x1b8   : > { %1253 = vmatmul.msk.bf16.gmra.mxu3 %vm696_vm2, %v693_v33 }
 0x1c7   : > { %v694_v48 = vpop.trf.xlu1 }
 0x1c8   : > { %1254 = vmatmul.msk.bf16.gmra.mxu3 %vm696_vm2, %v694_v48 }
 0x1d7   : > { %v695_v59 = vpop.trf.xlu1 }
 0x1d8   : > { %1255 = vmatmul.msk.bf16.gmra.mxu3 %vm696_vm2, %v695_v59 }
 0x1eb   : > { %v734_v26 = vpop.f32.mrf.mxu2 }
 0x1f3   : > { %v736_v27 = vpop.f32.mrf.mxu2 }
 0x1fb   : > { %v739_v28 = vpop.f32.mrf.mxu2 }
 0x203   : > { %v741_v30 = vpop.f32.mrf.mxu2 }
 0x20b   : > { %v744_v31 = vpop.f32.mrf.mxu2 }
 0x20c   : > { %v823_v36 = vmax.f32 %v734_v26, %v744_v31 }
 0x20e   : > { %v827_v40 = vmax.f32 %v823_v36, -1e+30 }
 0x210   : > { %v831_v45 = vmax.f32 %v827_v40, -1e+30 }
 0x213   : > { %v746_v32 = vpop.f32.mrf.mxu2 }
 0x214   : > { %v824_v35 = vmax.f32 %v736_v27, %v746_v32 }
 0x216   : > { %v828_v38 = vmax.f32 %v824_v35, -1e+30 }
 0x218   : > { %v832_v43 = vmax.f32 %v828_v38, -1e+30 }
 0x21a   : > { %v835_v49 = vmax.f32 %v831_v45, %v832_v43 }
 0x21b   : > { %v749_v34 = vpop.f32.mrf.mxu2 }
 0x21c   : > { %v825_v37 = vmax.f32 %v739_v28, %v749_v34 }
 0x21e   : > { %v829_v41 = vmax.f32 %v825_v37, -1e+30 }
 0x220   : > { %v833_v46 = vmax.f32 %v829_v41, -1e+30 }
 0x223   : > { %v751_v39 = vpop.f32.mrf.mxu2 }
 0x224   : > { %v826_v42 = vmax.f32 %v741_v30, %v751_v39 }
 0x226   : > { %v830_v44 = vmax.f32 %v826_v42, -1e+30 }
 0x228   : > { %v834_v47 = vmax.f32 %v830_v44, -1e+30  ;;  %v655_v44 = vpop.permute.xlu1 %654 }
 0x229   : > { %v676_v45 = vadd.f32 %v675_v7, %v655_v44 }
 0x22a   : > { %v836_v50 = vmax.f32 %v833_v46, %v834_v47 }
 0x22b   : > { %v679_v47 = vpack.c.bf16 %v676_v45, %v676_v45  ;;  %v754_v48 = vpop.f32.mrf.mxu3 }
 0x22c   : > { %v837_v51 = vmax.f32 %v835_v49, %v836_v50 }
 0x22e   : > { %v838_v52 = vrot.slane %v837_v51, 4 }
 0x230   : > { %v839_v53 = vmax.f32 %v837_v51, %v838_v52 }
 0x232   : > { %v840_v55 = vrot.slane %v839_v53, 2 }
 0x233   : > { %v756_v49 = vpop.f32.mrf.mxu3 }
 0x234   : > { %v841_v56 = vmax.f32 %v839_v53, %v840_v55 }
 0x236   : > { %v842_v57 = vrot.slane %v841_v56, 1 }
 0x238   : > { %v843_v58 = vmax.f32 %v841_v56, %v842_v57 }
 0x23a   : > { %v844_v60 = vsub.f32 %v734_v26, %v843_v58  ;;  %v845_v61 = vsub.f32 %v736_v27, %v843_v58  ;;  %v846_v62 = vsub.f32 %v739_v28, %v843_v58  ;;  %v847_v63 = vsub.f32 %v741_v30, %v843_v58 }
 0x23b   : > { %v848_v2 = vsub.f32 %v744_v31, %v843_v58  ;;  %v852_v5 = vsub.f32 -1e+30, %v843_v58  ;;  %v849_v6 = vsub.f32 %v746_v32, %v843_v58  ;;  %v850_v8 = vsub.f32 %v749_v34, %v843_v58  ;;  %v759_v50 = vpop.f32.mrf.mxu3 }
 0x23c   : > { %v860_v0 = vmul.f32 1.442695, %v844_v60  ;;  %v862_v1 = vmul.f32 1.442695, %v845_v61  ;;  %v864_v3 = vmul.f32 1.442695, %v846_v62  ;;  %v851_v11 = vsub.f32 %v751_v39, %v843_v58 }
 0x23d   : > { %v866_v4 = vmul.f32 1.442695, %v847_v63  ;;  %v868_v9 = vmul.f32 1.442695, %v848_v2  ;;  %v876_v10 = vmul.f32 1.442695, %v852_v5 }
 0x23e   : > { %1354 = vpow2.f32 %v860_v0  ;;  %v870_v12 = vmul.f32 1.442695, %v849_v6  ;;  %v872_v15 = vmul.f32 1.442695, %v850_v8  ;;  %v874_v19 = vmul.f32 1.442695, %v851_v11 }
 0x23f   : > { %1356 = vpow2.f32 %v862_v1  ;;  %v937_v5 = vld [vmem:[#allocation2] sm:$0xff]  ;;  %v938_v8 = vld [vmem:[#allocation2 + $0x8] sm:$0xff] }
 0x240   : > { %1358 = vpow2.f32 %v864_v3  ;;  %v948_v3 = vpop.trf.xlu2 }
 0x241   : > { %1360 = vpow2.f32 %v866_v4 }
 0x242   : > { %1362 = vpow2.f32 %v868_v9 }
 0x243   : > { %1364 = vpow2.f32 %v876_v10  ;;  %v761_v51 = vpop.f32.mrf.mxu3 }
 0x244   : > { %v1355_v13 = vpop.eup %1354  ;;  %1366 = vpow2.f32 %v870_v12 }
 0x245   : > { %v1357_v14 = vpop.eup %1356  ;;  %1368 = vpow2.f32 %v872_v15 }
 0x246   : > { %v1359_v16 = vpop.eup %1358  ;;  %v892_v17 = vadd.f32 %v1357_v14, %v1355_v13  ;;  %1370 = vpow2.f32 %v874_v19  ;;  %v913_v46 = vpack.c.bf16 %v1357_v14, %v1355_v13 }
 0x247   : > { %v1361_v18 = vpop.eup %1360 }
 0x248   : > { %v893_v21 = vadd.f32 %v1359_v16, %v892_v17  ;;  %v914_v22 = vpack.c.bf16 %v1361_v18, %v1359_v16  ;;  %v1363_v24 = vpop.eup %1362 }
 0x249   : > { %v1365_v25 = vpop.eup %1364 }
 0x24a   : > { %v894_v23 = vadd.f32 %v1361_v18, %v893_v21  ;;  %v1367_v27 = vpop.eup %1366  ;;  %v917_v28 = vpack.c.bf16 %v1365_v25, %v1365_v25 }
 0x24b   : > { %v1369_v30 = vpop.eup %1368  ;;  %v915_v42 = vpack.c.bf16 %v1367_v27, %v1363_v24  ;;  %v764_v52 = vpop.f32.mrf.mxu3 }
 0x24c   : > { %v895_v26 = vadd.f32 %v1363_v24, %v894_v23  ;;  %921 = vmatpush.bf16.msrb.mxu0 %v917_v28  ;;  %v1371_v32 = vpop.eup %1370 }
 0x24d   : > { %v916_v39 = vpack.c.bf16 %v1371_v32, %v1369_v30 }
 0x24e   : > { %v896_v29 = vadd.f32 %v1367_v27, %v895_v26 }
 0x250   : > { %v897_v31 = vadd.f32 %v1369_v30, %v896_v29  ;;  %922 = vmatpush.bf16.msrb.mxu0 %v917_v28 }
 0x252   : > { %v898_v33 = vadd.f32 %v1371_v32, %v897_v31 }
 0x253   : > { %v766_v53 = vpop.f32.mrf.mxu3 }
 0x254   : > { %v899_v34 = vadd.f32 %v1365_v25, %v898_v33  ;;  %923 = vmatpush.bf16.msrb.mxu0 %v917_v28 }
 0x256   : > { %v900_v35 = vadd.f32 %v1365_v25, %v899_v34 }
 0x258   : > { %v901_v36 = vadd.f32 %v1365_v25, %v900_v35  ;;  %924 = vmatpush.bf16.msrb.mxu0 %v917_v28 }
 0x25a   : > { %v902_v37 = vadd.f32 %v1365_v25, %v901_v36 }
 0x25b   : > { %v769_v54 = vpop.f32.mrf.mxu3 }
 0x25c   : > { %v903_v38 = vadd.f32 %v1365_v25, %v902_v37  ;;  %925 = vmatpush.bf16.msrb.mxu0 %v916_v39 }
 0x25e   : > { %v904_v40 = vadd.f32 %v1365_v25, %v903_v38 }
 0x260   : > { %v905_v41 = vadd.f32 %v1365_v25, %v904_v40  ;;  %926 = vmatpush.bf16.msrb.mxu0 %v915_v42 }
 0x262   : > { %v906_v43 = vadd.f32 %v1365_v25, %v905_v41 }
 0x263   : > { %v771_v55 = vpop.f32.mrf.mxu3 }
 0x264   : > { %927 = vmatpush.bf16.msrb.mxu0 %v914_v22  ;;  %v907_v56 = vrot.slane %v906_v43, 4 }
 0x266   : > { %v908_v57 = vadd.f32 %v907_v56, %v906_v43 }
 0x268   : > { %928 = vmatpush.bf16.msrb.mxu0 %v913_v46  ;;  %v909_v58 = vrot.slane %v908_v57, 2 }
 0x26a   : > { %v910_v59 = vadd.f32 %v909_v58, %v908_v57 }
 0x26b   : > { %929 = vmatmul.bf16.vlgmr.msrb.gmra.mxu0 %v679_v47 }
 0x26c   : > { %v911_v60 = vrot.slane %v910_v59, 1 }
 0x26e   : > { %v912_v61 = vadd.f32 %v911_v60, %v910_v59 }
 0x270   : > { %1372 = vrcp.f32 %v912_v61 }
 0x276   : > { %v1373_v62 = vpop.eup %1372 }
 0x2e8   : > { %v930_v63 = vpop.f32.mrf.mxu0 }
 0x2e9   : > { %v935_v0 = vmul.f32 %v1373_v62, %v930_v63 }
 0x2eb   : > { %v936_v1 = vpack.c.bf16 %v935_v0, %v935_v0 }
 0x2ed   : > { %v960_v2 = vsel %vm721_vm1, %v936_v1, 0 }
 0x2ee   : > { %969 = vmatpush.bf16.msra.mxu1 %v960_v2 }
 0x2f0   : > { %v932_v4 = vpop.f32.mrf.mxu0 }
 0x2f1   : > { %1256 = vmatmul.msk.bf16.vlgmr.msra.gmra.mxu1 %vm696_vm2, %v948_v3 }
 0x36e   : > { %v971_v6 = vpop.f32.mrf.mxu1 }
 0x36f   : > { %v976_v7 = vadd.f32 %v971_v6, %v937_v5 }
 0x371   : > { %978 = vst [vmem:[#allocation2] sm:$0xff] %v976_v7 }
 0x375   : > { %983 = sbr.rel (%p1257_p1) target bundleno = 1020 (0x3fc), region = 72 }
 0x376   : > { %v973_v9 = vpop.f32.mrf.mxu1 }
 0x377   : > { %v977_v10 = vadd.f32 %v973_v9, %v938_v8 }
 0x379   : > { %979 = vst [vmem:[#allocation2 + $0x8] sm:$0xff] %v977_v10 }
 0x37a   : > { %v986_v11 = vld [vmem:[%s1803_s14] sm:$0xff]  ;;  %v1473_v12 = vmov 0   ;;  %v987_v13 = vld [vmem:[%s1803_s14 + $0x8] sm:$0xff] }
 0x37b   : > { %1374 = vset.pattern.permute.xlu0 %v1473_v12  ;;  %v984_v15 = vld [vmem:[#allocation2] sm:$0xff] }
 0x37c   : > { %990 = vperm.xlu0 %1374, %v986_v11  }
 0x380   : > { %v985_v16 = vld [vmem:[#allocation2 + $0x8] sm:$0xff] }
 0x384   : > { %995 = vperm.xlu0 %1374, %v987_v13  }
 0x3ee   : > { %v991_v14 = vpop.permute.xlu0 %990 }
 0x3ef   : > { %v998_v18 = vadd.f32 %v991_v14, %v984_v15 }
 0x3f6   : > { %v996_v17 = vpop.permute.xlu0 %995 }
 0x3f7   : > { %v999_v19 = vadd.f32 %v996_v17, %v985_v16 }
 0x3f9   : > { %v1273_v20 = vpack.c.bf16 %v999_v19, %v998_v18 }
 0x3fb   : > { %1274 = vst [vmem:[%s529_s10] sm:$0xff] %v1273_v20  }
 0x3fc PF: > { %s1804_s20 = sld [smem:[#allocation9_spill]]  ;;  %s1018_s22 = sshll.u32 %s529_s10, 4  ;;  %s1019_s22 = int_to_ptr.vmem [resolvable:$true] %s1018_s22 }
 0x3fd   : > { %s1805_s19 = sld [smem:[#allocation7_spill]] }
 0x3fe   : > { %s1807_s26 = sld [smem:[#allocation23_spill]] }
 0x402   : > { %s1269_s15 = sshll.u32 %s1804_s20, 3 }
 0x403   : > { %s1808_s3 = sand.u32 1, %s1805_s19  }
 0x404   : > { %s1017_s0 = scalar_lea.hbm %s1807_s26, %s1269_s15  ;;  %s1005_s11 = scalar_lea.sflag [#allocation4], %s1808_s3 }
 0x405   : > { %s1020_s1 = sshll.u32 %s1017_s0, 4  ;;  %s1395_s21 = scalar_lea.hbm %s1807_s26, 16  ;;  %s1021_s1 = int_to_ptr.hbm [resolvable:$true] %s1020_s1 }
 0x406   : > { %s1389_s18 = sshra.s32 %s1021_s1, 4  ;;  %s1390_s18 = int_to_ptr.hbm [resolvable:$true] %s1389_s18 }
 0x407   : > { %s1391_s27 = scalar_lea.hbm %s1390_s18, 8  ;;  %p1396_p6 = scmp.lt.s32.totalorder %s1390_s18, %s1807_s26 }
 0x408   : > { %p1392_p2 = scmp.ne.s32.totalorder %s1390_s18, %s1391_s27  ;;  %p1397_p7 = scmp.lt.s32.totalorder %s1395_s21, %s1391_s27 }
 0x40a   : > { %p1393_p4 = pnand %p1392_p2, %p1585_p3  ;;  %p1398_p8 = por %p1397_p7, %p1396_p6 }
 0x40c   : > { %p1394_p5 = pneg %p1393_p4 }
 0x40e   : > { %p1399_p10 = pnand %p1398_p8, %p1394_p5 }
 0x410   : > { %1402 = shalt.err (!%p1399_p10)
}
 0x411   : > { %s1474_s10 = smov 64   ;;  %s1475_s16 = smov 4  }
 0x412   : > { %1276 = dma.vmem_to_hbm [thread:$0]  (%p1585_p3), %s1019_s22, 128, %s1021_s1, %s1005_s11, %s1474_s10, %s1474_s10, %s1475_s16  }
 0x413 PF: > { %s1809_s17 = sld [smem:[#allocation12_spill]] }
 0x414   : > { %s1810_s12 = sld [smem:[#allocation6_spill]] }
 0x419   : > { %p1282_p11 = scmp.ge.s32.totalorder %s1809_s17, 2 }
 0x41a   : > { %s1035_s20 = sand.u32 1, %s1810_s12  }
 0x41b   : > { %p1279_p12 = pnand %p1282_p11, %p1595_p9  ;;  %s1036_s19 = scalar_lea.sflag [#allocation4], %s1035_s20 }
 0x41d   : > { %p1280_p13 = pneg %p1279_p12 }
 0x41f   : > { %1436 = dma.done.wait (%p1280_p13), %s1036_s19, 128  }
 0x420   : > { %1438 = vsyncadd (%p1280_p13), %s1036_s19, 4294967168  ;;  %s24_s24 = sadd.s32 1, %s1809_s17   ;;  %s1812_s17 = sld [smem:[#allocation7_spill]] }
 0x421   : > { %p21_p0 = scmp.ge.s32.totalorder %s24_s24, 10   ;;  %s1813_s18 = sld [smem:[#allocation8_spill]] }
 0x422   : > { %s1814_s19 = sld [smem:[#allocation17_spill]] }
 0x423   : > { %s1815_s20 = sld [smem:[#allocation10_spill]]  ;;  %23 = sbr.rel (!%p21_p0) target bundleno = 12 (0xc), region = 134 }
 0x424   : > { %s1816_s21 = sld [smem:[#allocation11_spill]] }
 0x425   : > { %s1817_s22 = sld [smem:[#allocation13_spill]] }
 0x426   : > { %s1818_s23 = sld [smem:[#allocation15_spill]] }
 0x428   :  { %1042 = vsyncpa [#allocation4], 1 }
 0x429   :  { %1044 = vsyncpa [#allocation4 + $0x1], 1 }

</bundles_post_ra>
